<compile_context>
chip_gen: v6e
topology: v6e:2x2x1
jax: 0.10.0
libtpu: 0.0.40
codegen_flags: <defaults>
</compile_context>

<pallas_src>
import functools

import jax
import jax.numpy as jnp
from jax import lax
from jax.experimental import pallas as pl
from jax.experimental.pallas import tpu as pltpu


def _round_up(v, m):
    return ((v + m - 1) // m) * m


def _entropy_kernel(x_ref, p_ref, o_ref, *, k):
    # x_ref: (1, T)   p_ref: (3K, T)   o_ref: (1, T)
    x = x_ref[...].astype(jnp.float32)

    half = jnp.float32(0.5 / 255.0)
    inv_sqrt2 = jnp.float32(0.7071067811865476)  # 1/sqrt(2)

    # Pass 1: running max of the mixture logits (numerically stable softmax).
    m = p_ref[2 * k:2 * k + 1, :].astype(jnp.float32)
    for i in range(1, k):
        m = jnp.maximum(m, p_ref[2 * k + i:2 * k + i + 1, :].astype(jnp.float32))

    # Pass 2: accumulate unnormalized-softmax-weighted likelihood.
    # Only two spatial-sized accumulators stay live (num, den).
    num = jnp.zeros_like(x)
    den = jnp.zeros_like(x)
    for i in range(k):
        mean = p_ref[i:i + 1, :].astype(jnp.float32)
        scale = jnp.maximum(p_ref[k + i:k + i + 1, :].astype(jnp.float32),
                            jnp.float32(1e-6))
        logit = p_ref[2 * k + i:2 * k + i + 1, :].astype(jnp.float32)

        e = jnp.exp(logit - m)                       # unnormalized softmax weight
        inv = inv_sqrt2 / scale                      # 1 / (scale * sqrt(2))
        d = x - mean
        # CDF(x+h) - CDF(x-h) = 0.5*(erf(a_hi) - erf(a_lo))  (constants folded)
        like = 0.5 * jnp.abs(lax.erf((d + half) * inv) - lax.erf((d - half) * inv))

        num = num + e * like
        den = den + e

    # Single softmax-normalizing divide per spatial element.
    o_ref[...] = (num / den).astype(o_ref.dtype)


def distribution_for_entropy2(x, p_dec, *, tile=2048):
    """Pallas equivalent of Distribution_for_entropy2.forward(x, p_dec).

    x:     (N, 1, H, W)
    p_dec: (N, 3K, H, W)  -> K means, K scales, K mixture logits
    returns (N, 1, H, W) float32 likelihoods.
    """
    n, c, h, w = p_dec.shape
    if c % 3 != 0:
        raise ValueError("channel number must be multiple of 3")
    assert x.shape == (n, 1, h, w), "x must be (N, 1, H, W)"
    k = c // 3
    hw = h * w

    # Flatten spatial dims onto a single lane-dense axis.
    x_flat = x.reshape(n, 1, hw)
    p_flat = p_dec.reshape(n, c, hw)

    # Lane tile: multiple of 128, capped by the (128-rounded) spatial extent.
    t = min(_round_up(tile, 128), _round_up(hw, 128))
    hw_pad = _round_up(hw, t)
    if hw_pad != hw:
        # Zero padding is safe: scales clamp to 1e-6, logits 0 -> finite softmax;
        # padded outputs are sliced away below.
        x_flat = jnp.pad(x_flat, ((0, 0), (0, 0), (0, hw_pad - hw)))
        p_flat = jnp.pad(p_flat, ((0, 0), (0, 0), (0, hw_pad - hw)))

    grid = (n, hw_pad // t)
    kernel = functools.partial(_entropy_kernel, k=k)

    # Advisory cost hint for XLA scheduling around this EUP-heavy call.
    elems = n * hw
    cost = pl.CostEstimate(
        flops=elems * (15 * k + 2),
        transcendentals=elems * (3 * k + 1),      # exp + 2*erf per comp + final div
        bytes_accessed=4 * elems * (c + 2),       # p_dec + x + out (f32)
    )

    out = pl.pallas_call(
        kernel,
        out_shape=jax.ShapeDtypeStruct((n, 1, hw_pad), jnp.float32),
        grid_spec=pltpu.PrefetchScalarGridSpec(
            num_scalar_prefetch=0,
            grid=grid,
            in_specs=[
                pl.BlockSpec((None, 1, t), lambda b, s: (b, 0, s)),
                pl.BlockSpec((None, c, t), lambda b, s: (b, 0, s)),
            ],
            out_specs=pl.BlockSpec((None, 1, t), lambda b, s: (b, 0, s)),
        ),
        compiler_params=pltpu.CompilerParams(
            dimension_semantics=("parallel", "parallel"),
        ),
        cost_estimate=cost,
    )(x_flat, p_flat)

    return out[:, :, :hw].reshape(n, 1, h, w)


def _reference(x, p_dec):
    """Pure-JAX reference mirroring the PyTorch forward exactly."""
    c = p_dec.shape[1]
    k = c // 3
    means = p_dec[:, :k]
    scales = jnp.maximum(p_dec[:, k:2 * k], 1e-6)
    logits = p_dec[:, 2 * k:]
    probs = jax.nn.softmax(logits, axis=1)
    half = 0.5 / 255.0

    def cdf(v):
        return 0.5 * (1.0 + lax.erf((v - means) / (scales * jnp.sqrt(2.0))))

    like = jnp.abs(cdf(x + half) - cdf(x - half))
    return jnp.sum(probs * like, axis=1, keepdims=True)


if __name__ == "__main__":
    key = jax.random.PRNGKey(0)
    kx, kp = jax.random.split(key)

    N, H, W = 2, 16, 16
    gauss_num = 3                      # K gaussians -> 3K channels in p_dec
    C = 3 * gauss_num                  # 9

    # x in roughly [-1, 1] like normalized pixel residuals
    x = jax.random.uniform(kx, (N, 1, H, W), jnp.float32, minval=-1.0, maxval=1.0)
    # p_dec: raw decoder output (means / scales / logits all drawn from normal)
    p_dec = jax.random.normal(kp, (N, C, H, W), jnp.float32)

    out = distribution_for_entropy2(x, p_dec)
    out = jax.block_until_ready(out)

    ref = _reference(x, p_dec)
    assert out.shape == (N, 1, H, W)
    assert jnp.allclose(out, ref, atol=1e-5, rtol=1e-5), "mismatch vs reference"

    print("KERNEL_OK")
</pallas_src>

<mosaic_0001>
module attributes {stable_mosaic.version = 11 : i64} {
  func.func @_entropy_kernel(%arg0: i32, %arg1: i32, %arg2: memref<1x1x256xf32, #tpu.memory_space<vmem>>, %arg3: memref<1x9x256xf32, #tpu.memory_space<vmem>>, %arg4: memref<1x1x256xf32, #tpu.memory_space<vmem>>) attributes {dimension_semantics = [#tpu.dimension_semantics<parallel>, #tpu.dimension_semantics<parallel>], iteration_bounds = array<i64: 2, 1>, scalar_prefetch = 0 : i64, scratch_operands = 0 : i64, tpu.core_type = #tpu.core_type<tc>, window_params = [{transform_indices = @transform_0, window_bounds = array<i64: 1, 1, 256>}, {transform_indices = @transform_1, window_bounds = array<i64: 1, 9, 256>}, {transform_indices = @transform_2, window_bounds = array<i64: 1, 1, 256>}]} {
    %c0 = arith.constant 0 : index
    %c0_0 = arith.constant 0 : index
    %c0_1 = arith.constant 0 : index
    %0 = vector.load %arg2[%c0, %c0_0, %c0_1] : memref<1x1x256xf32, #tpu.memory_space<vmem>>, vector<1x1x256xf32>
    %1 = vector.shape_cast %0 : vector<1x1x256xf32> to vector<1x256xf32>
    %c0_2 = arith.constant 0 : index
    %c6 = arith.constant 6 : index
    %c0_3 = arith.constant 0 : index
    %2 = vector.load %arg3[%c0_2, %c6, %c0_3] : memref<1x9x256xf32, #tpu.memory_space<vmem>>, vector<1x1x256xf32>
    %3 = vector.shape_cast %2 : vector<1x1x256xf32> to vector<1x256xf32>
    %c0_4 = arith.constant 0 : index
    %c7 = arith.constant 7 : index
    %c0_5 = arith.constant 0 : index
    %4 = vector.load %arg3[%c0_4, %c7, %c0_5] : memref<1x9x256xf32, #tpu.memory_space<vmem>>, vector<1x1x256xf32>
    %5 = vector.shape_cast %4 : vector<1x1x256xf32> to vector<1x256xf32>
    %6 = arith.maximumf %3, %5 : vector<1x256xf32>
    %c0_6 = arith.constant 0 : index
    %c8 = arith.constant 8 : index
    %c0_7 = arith.constant 0 : index
    %7 = vector.load %arg3[%c0_6, %c8, %c0_7] : memref<1x9x256xf32, #tpu.memory_space<vmem>>, vector<1x1x256xf32>
    %8 = vector.shape_cast %7 : vector<1x1x256xf32> to vector<1x256xf32>
    %9 = arith.maximumf %6, %8 : vector<1x256xf32>
    %cst = arith.constant 0.000000e+00 : f32
    %10 = vector.broadcast %cst : f32 to vector<1x256xf32>
    %cst_8 = arith.constant 0.000000e+00 : f32
    %11 = vector.broadcast %cst_8 : f32 to vector<1x256xf32>
    %c0_9 = arith.constant 0 : index
    %c0_10 = arith.constant 0 : index
    %c0_11 = arith.constant 0 : index
    %12 = vector.load %arg3[%c0_9, %c0_10, %c0_11] : memref<1x9x256xf32, #tpu.memory_space<vmem>>, vector<1x1x256xf32>
    %13 = vector.shape_cast %12 : vector<1x1x256xf32> to vector<1x256xf32>
    %c0_12 = arith.constant 0 : index
    %c3 = arith.constant 3 : index
    %c0_13 = arith.constant 0 : index
    %14 = vector.load %arg3[%c0_12, %c3, %c0_13] : memref<1x9x256xf32, #tpu.memory_space<vmem>>, vector<1x1x256xf32>
    %15 = vector.shape_cast %14 : vector<1x1x256xf32> to vector<1x256xf32>
    %cst_14 = arith.constant 9.99999997E-7 : f32
    %16 = vector.broadcast %cst_14 : f32 to vector<1x256xf32>
    %17 = arith.maximumf %15, %16 : vector<1x256xf32>
    %c0_15 = arith.constant 0 : index
    %c6_16 = arith.constant 6 : index
    %c0_17 = arith.constant 0 : index
    %18 = vector.load %arg3[%c0_15, %c6_16, %c0_17] : memref<1x9x256xf32, #tpu.memory_space<vmem>>, vector<1x1x256xf32>
    %19 = vector.shape_cast %18 : vector<1x1x256xf32> to vector<1x256xf32>
    %20 = arith.subf %19, %9 : vector<1x256xf32>
    %21 = math.exp %20 : vector<1x256xf32>
    %cst_18 = arith.constant 0.707106769 : f32
    %22 = vector.broadcast %cst_18 : f32 to vector<1x256xf32>
    %23 = arith.divf %22, %17 : vector<1x256xf32>
    %24 = arith.subf %1, %13 : vector<1x256xf32>
    %cst_19 = arith.constant 0.00196078443 : f32
    %25 = vector.broadcast %cst_19 : f32 to vector<1x256xf32>
    %26 = arith.addf %24, %25 : vector<1x256xf32>
    %27 = arith.mulf %26, %23 : vector<1x256xf32>
    %28 = math.erf %27 : vector<1x256xf32>
    %cst_20 = arith.constant 0.00196078443 : f32
    %29 = vector.broadcast %cst_20 : f32 to vector<1x256xf32>
    %30 = arith.subf %24, %29 : vector<1x256xf32>
    %31 = arith.mulf %30, %23 : vector<1x256xf32>
    %32 = math.erf %31 : vector<1x256xf32>
    %33 = arith.subf %28, %32 : vector<1x256xf32>
    %34 = math.absf %33 : vector<1x256xf32>
    %cst_21 = arith.constant 5.000000e-01 : f32
    %35 = vector.broadcast %cst_21 : f32 to vector<1x256xf32>
    %36 = arith.mulf %35, %34 : vector<1x256xf32>
    %37 = arith.mulf %21, %36 : vector<1x256xf32>
    %38 = arith.addf %10, %37 : vector<1x256xf32>
    %39 = arith.addf %11, %21 : vector<1x256xf32>
    %c0_22 = arith.constant 0 : index
    %c1 = arith.constant 1 : index
    %c0_23 = arith.constant 0 : index
    %40 = vector.load %arg3[%c0_22, %c1, %c0_23] : memref<1x9x256xf32, #tpu.memory_space<vmem>>, vector<1x1x256xf32>
    %41 = vector.shape_cast %40 : vector<1x1x256xf32> to vector<1x256xf32>
    %c0_24 = arith.constant 0 : index
    %c4 = arith.constant 4 : index
    %c0_25 = arith.constant 0 : index
    %42 = vector.load %arg3[%c0_24, %c4, %c0_25] : memref<1x9x256xf32, #tpu.memory_space<vmem>>, vector<1x1x256xf32>
    %43 = vector.shape_cast %42 : vector<1x1x256xf32> to vector<1x256xf32>
    %cst_26 = arith.constant 9.99999997E-7 : f32
    %44 = vector.broadcast %cst_26 : f32 to vector<1x256xf32>
    %45 = arith.maximumf %43, %44 : vector<1x256xf32>
    %c0_27 = arith.constant 0 : index
    %c7_28 = arith.constant 7 : index
    %c0_29 = arith.constant 0 : index
    %46 = vector.load %arg3[%c0_27, %c7_28, %c0_29] : memref<1x9x256xf32, #tpu.memory_space<vmem>>, vector<1x1x256xf32>
    %47 = vector.shape_cast %46 : vector<1x1x256xf32> to vector<1x256xf32>
    %48 = arith.subf %47, %9 : vector<1x256xf32>
    %49 = math.exp %48 : vector<1x256xf32>
    %cst_30 = arith.constant 0.707106769 : f32
    %50 = vector.broadcast %cst_30 : f32 to vector<1x256xf32>
    %51 = arith.divf %50, %45 : vector<1x256xf32>
    %52 = arith.subf %1, %41 : vector<1x256xf32>
    %cst_31 = arith.constant 0.00196078443 : f32
    %53 = vector.broadcast %cst_31 : f32 to vector<1x256xf32>
    %54 = arith.addf %52, %53 : vector<1x256xf32>
    %55 = arith.mulf %54, %51 : vector<1x256xf32>
    %56 = math.erf %55 : vector<1x256xf32>
    %cst_32 = arith.constant 0.00196078443 : f32
    %57 = vector.broadcast %cst_32 : f32 to vector<1x256xf32>
    %58 = arith.subf %52, %57 : vector<1x256xf32>
    %59 = arith.mulf %58, %51 : vector<1x256xf32>
    %60 = math.erf %59 : vector<1x256xf32>
    %61 = arith.subf %56, %60 : vector<1x256xf32>
    %62 = math.absf %61 : vector<1x256xf32>
    %cst_33 = arith.constant 5.000000e-01 : f32
    %63 = vector.broadcast %cst_33 : f32 to vector<1x256xf32>
    %64 = arith.mulf %63, %62 : vector<1x256xf32>
    %65 = arith.mulf %49, %64 : vector<1x256xf32>
    %66 = arith.addf %38, %65 : vector<1x256xf32>
    %67 = arith.addf %39, %49 : vector<1x256xf32>
    %c0_34 = arith.constant 0 : index
    %c2 = arith.constant 2 : index
    %c0_35 = arith.constant 0 : index
    %68 = vector.load %arg3[%c0_34, %c2, %c0_35] : memref<1x9x256xf32, #tpu.memory_space<vmem>>, vector<1x1x256xf32>
    %69 = vector.shape_cast %68 : vector<1x1x256xf32> to vector<1x256xf32>
    %c0_36 = arith.constant 0 : index
    %c5 = arith.constant 5 : index
    %c0_37 = arith.constant 0 : index
    %70 = vector.load %arg3[%c0_36, %c5, %c0_37] : memref<1x9x256xf32, #tpu.memory_space<vmem>>, vector<1x1x256xf32>
    %71 = vector.shape_cast %70 : vector<1x1x256xf32> to vector<1x256xf32>
    %cst_38 = arith.constant 9.99999997E-7 : f32
    %72 = vector.broadcast %cst_38 : f32 to vector<1x256xf32>
    %73 = arith.maximumf %71, %72 : vector<1x256xf32>
    %c0_39 = arith.constant 0 : index
    %c8_40 = arith.constant 8 : index
    %c0_41 = arith.constant 0 : index
    %74 = vector.load %arg3[%c0_39, %c8_40, %c0_41] : memref<1x9x256xf32, #tpu.memory_space<vmem>>, vector<1x1x256xf32>
    %75 = vector.shape_cast %74 : vector<1x1x256xf32> to vector<1x256xf32>
    %76 = arith.subf %75, %9 : vector<1x256xf32>
    %77 = math.exp %76 : vector<1x256xf32>
    %cst_42 = arith.constant 0.707106769 : f32
    %78 = vector.broadcast %cst_42 : f32 to vector<1x256xf32>
    %79 = arith.divf %78, %73 : vector<1x256xf32>
    %80 = arith.subf %1, %69 : vector<1x256xf32>
    %cst_43 = arith.constant 0.00196078443 : f32
    %81 = vector.broadcast %cst_43 : f32 to vector<1x256xf32>
    %82 = arith.addf %80, %81 : vector<1x256xf32>
    %83 = arith.mulf %82, %79 : vector<1x256xf32>
    %84 = math.erf %83 : vector<1x256xf32>
    %cst_44 = arith.constant 0.00196078443 : f32
    %85 = vector.broadcast %cst_44 : f32 to vector<1x256xf32>
    %86 = arith.subf %80, %85 : vector<1x256xf32>
    %87 = arith.mulf %86, %79 : vector<1x256xf32>
    %88 = math.erf %87 : vector<1x256xf32>
    %89 = arith.subf %84, %88 : vector<1x256xf32>
    %90 = math.absf %89 : vector<1x256xf32>
    %cst_45 = arith.constant 5.000000e-01 : f32
    %91 = vector.broadcast %cst_45 : f32 to vector<1x256xf32>
    %92 = arith.mulf %91, %90 : vector<1x256xf32>
    %93 = arith.mulf %77, %92 : vector<1x256xf32>
    %94 = arith.addf %66, %93 : vector<1x256xf32>
    %95 = arith.addf %67, %77 : vector<1x256xf32>
    %96 = arith.divf %94, %95 : vector<1x256xf32>
    %c0_46 = arith.constant 0 : index
    %c0_47 = arith.constant 0 : index
    %c0_48 = arith.constant 0 : index
    %97 = vector.load %arg4[%c0_46, %c0_47, %c0_48] : memref<1x1x256xf32, #tpu.memory_space<vmem>>, vector<1x1x256xf32>
    %98 = vector.shape_cast %97 : vector<1x1x256xf32> to vector<1x256xf32>
    %99 = vector.shape_cast %96 : vector<1x256xf32> to vector<1x1x256xf32>
    tpu.vector_store %arg4[%c0_46, %c0_47, %c0_48], %99 {strides = array<i32>} : memref<1x1x256xf32, #tpu.memory_space<vmem>>, vector<1x1x256xf32>,
    return
  }
  func.func @transform_0(%arg0: i32, %arg1: i32) -> (i32, i32, i32) {
    %c0_i32 = arith.constant 0 : i32
    %c0_i32_0 = arith.constant 0 : i32
    return %arg0, %c0_i32, %arg1 : i32, i32, i32
  }
  func.func @transform_1(%arg0: i32, %arg1: i32) -> (i32, i32, i32) {
    %c0_i32 = arith.constant 0 : i32
    %c0_i32_0 = arith.constant 0 : i32
    return %arg0, %c0_i32, %arg1 : i32, i32, i32
  }
  func.func @transform_2(%arg0: i32, %arg1: i32) -> (i32, i32, i32) {
    %c0_i32 = arith.constant 0 : i32
    %c0_i32_0 = arith.constant 0 : i32
    return %arg0, %c0_i32, %arg1 : i32, i32, i32
  }
}

</mosaic_0001>

<bundles_post_ra>
// kernel: tpu_custom_call.1
= control target key start
LH: loop header
LB: loop body
LE: loop exit
PB: predicated region body
PF: predicated region fallthrough
CT: control target
= control target key end

     0   :  { %7 = vsyncpa [#allocation3], 0  ;;  %s713_s0 = inlined_call_operand.vmem [shape: f32[2,1,256], index: 0, kind: input, shape index: {}]   ;;  %s714_s1 = inlined_call_operand.vmem [shape: f32[2,9,256], index: 1, kind: input, shape index: {}]   ;;  %s715_s2 = inlined_call_operand.hbm [shape: f32[2,1,256], index: 2, kind: output, shape index: {}]  }
   0x1   :  { %9 = vsyncpa [#allocation3 + $0x1], 0  ;;  %s600_s9 = smov 0   ;;  %s602_s10 = smov 0  }
   0x2   :  { %s604_s11 = smov 0   ;;  %s606_s12 = smov 0  }
   0x3   :  { %s608_s13 = smov 0   ;;  %s610_s14 = smov 0  }
   0x4 LB: > { %s398_s15 = sadd.s32 4294967295, %s582_s14   ;;  %s399_s16 = sadd.s32 4294967294, %s582_s14   ;;  %s582_s14 = sphi %s610_s14, %s15_s14   ;;  %s578_s13 = sphi %s608_s13, %s722_s13   ;;  %s574_s12 = sphi %s606_s12, %s721_s12   ;;  %s570_s11 = sphi %s604_s11, %s720_s11   ;;  %s566_s10 = sphi %s602_s10, %s719_s10   ;;  %s562_s9 = sphi %s600_s9, %s718_s9  }
   0x5   : > { %s27_s17 = sadd.s32 1, %s578_s13  ;;  %s92_s18 = sadd.s32 1, %s570_s11 }
   0x6   : > { %p29_p0 = scmp.ge.s32.totalorder %s27_s17, 2  ;;  %p102_p1 = scmp.ne.s32.totalorder %s570_s11, %s566_s10 }
   0x7   : > { %p103_p2 = scmp.eq.s32.totalorder %s398_s15, 1  ;;  %p108_p3 = scmp.ne.s32.totalorder %s566_s10, %s562_s9 }
   0x8   : > { %s724_s17 = smov (%p29_p0, %s27_s17), 0  ;;  %p109_p5 = scmp.eq.s32.totalorder %s399_s16, 1 }
   0x9   : > { %p640_p4 = por %p103_p2, %p102_p1  ;;  %s87_s20 = ssub.s32 %s578_s13, %s724_s17 }
   0xa   : > { %p402_p6 = scmp.ge.s32.totalorder %s582_s14, 1  ;;  %p90_p7 = scmp.eq.s32.totalorder %s87_s20, 0 }
   0xb   : > { %p647_p8 = por %p109_p5, %p108_p3  ;;  %p152_p9 = scmp.lt.s32.totalorder %s582_s14, 3 }
   0xc   : > { %s653_s22 = scalar_select %p90_p7, %s570_s11, %s92_s18  }
   0xd   : > { %p153_p10 = pnand %p402_p6, %p152_p9 }
   0xe   : > { %p187_p11 = scmp.lt.s32.totalorder (!%p153_p10), %s574_s12, 1  ;;  %s183_s4 = sand.u32 (!%p153_p10), 1, %s566_s10  }
   0xf   : > { %156 = sbr.rel (%p153_p10) target bundleno = 90 (0x5a), region = 28  ;;  %s403_s5 = sshll.u32 (!%p153_p10), %s183_s4, 1 }
  0x10   : > { %s185_s6 = scalar_lea.vmem (!%p153_p10), [#allocation2], %s403_s5  ;;  %s424_s8 = sshll.u32 (!%p153_p10), %s574_s12, 5 }
  0x11   : > { %s307_s7 = sshll.u32 (!%p153_p10), %s185_s6, 4  ;;  %s305_s18 = scalar_lea.hbm (!%p153_p10), %s715_s2, %s424_s8  ;;  %s308_s7 = int_to_ptr.vmem [resolvable:$true] %s307_s7 }
  0x12   : > { %s291_s20 = scalar_lea.sflag (!%p153_p10), [#allocation3], %s183_s4 }
  0x14   : > { %s188_s23 = scalar_select %p187_p11, %s574_s12, 1 }
  0x16   : > { %s423_s24 = sshll.u32 %s188_s23, 5  ;;  %s404_s28 = sshll.u32 %s188_s23, 1 }
  0x17   : > { %s660_s27 = scalar_lea.vmem %s714_s1, %s423_s24  ;;  %s193_s3 = scalar_lea.vmem %s713_s0, %s404_s28 }
  0x18   : > { %v407_v0 = vld [vmem:[%s660_s27 + $0x6] ss:$8 sm:$0x3]  ;;  %v408_v1 = vld [vmem:[%s660_s27 + $0x7] ss:$8 sm:$0x3] }
  0x19   : > { %v409_v2 = vld [vmem:[%s660_s27 + $0x10] ss:$8 sm:$0x3]  ;;  %v211_v3 = vmax.f32 %v407_v0, %v408_v1  ;;  %v410_v4 = vld [vmem:[%s660_s27 + $0x3] ss:$8 sm:$0x3] }
  0x1a   : > { %v218_v5 = vmax.f32 %v410_v4, 1e-06  ;;  %v413_v7 = vld [vmem:[%s660_s27 + $0x4] ss:$8 sm:$0x3]  ;;  %s506_s23 = scalar_lea.vmem %s308_s7, 32 }
  0x1b   : > { %v214_v6 = vmax.f32 %v211_v3, %v409_v2  ;;  %v241_v8 = vmax.f32 %v413_v7, 1e-06  ;;  %v416_v10 = vld [vmem:[%s660_s27 + $0x5] ss:$8 sm:$0x3]  ;;  %p507_p12 = scmp.ne.s32.totalorder %s308_s7, %s506_s23  ;;  %s584_s24 = smov [#allocation2]  }
  0x1c   : > { %480 = vrcp.f32 %v218_v5  ;;  %v264_v12 = vmax.f32 %v416_v10, 1e-06  ;;  %v206_v13 = vld [vmem:[%s193_s3] sm:$0x3]  ;;  %s510_s25 = sshll.u32 %s584_s24, 4  ;;  %s511_s25 = int_to_ptr.vmem [resolvable:$false] %s510_s25 }
  0x1d   : > { %v219_v9 = vsub.f32 %v407_v0, %v214_v6  ;;  %482 = vrcp.f32 %v241_v8  ;;  %v242_v11 = vsub.f32 %v408_v1, %v214_v6  ;;  %v215_v14 = vld [vmem:[%s660_s27] ss:$8 sm:$0x3]  ;;  %v412_v16 = vld [vmem:[%s660_s27 + $0x1] ss:$8 sm:$0x3]  ;;  %v265_v18 = vsub.f32 %v409_v2, %v214_v6  ;;  %p508_p13 = pnand %p507_p12, %p640_p4  ;;  %p513_p1 = scmp.lt.s32.totalorder %s308_s7, %s511_s25 }
  0x1e   : > { %v224_v19 = vsub.f32 %v206_v13, %v215_v14  ;;  %484 = vrcp.f32 %v264_v12  ;;  %v247_v20 = vsub.f32 %v206_v13, %v412_v16  ;;  %v415_v25 = vld [vmem:[%s660_s27 + $0x2] ss:$8 sm:$0x3]  ;;  %v285_v1 = vlaneseq  ;;  %s512_s26 = scalar_lea.vmem %s511_s25, 64 }
  0x1f   : > { %v220_v15 = vmul.f32 1.442695, %v219_v9  ;;  %v243_v17 = vmul.f32 1.442695, %v242_v11  ;;  %v266_v21 = vmul.f32 1.442695, %v265_v18  ;;  %v270_v33 = vsub.f32 %v206_v13, %v415_v25  ;;  %p509_p0 = pneg %p508_p13  ;;  %p514_p2 = scmp.lt.s32.totalorder %s512_s26, %s506_s23 }
  0x20   : > { %v225_v22 = vadd.f32 0.0019607844, %v224_v19  ;;  %v411_v23 = vadd.f32 -0.0019607844, %v224_v19  ;;  %v248_v27 = vadd.f32 0.0019607844, %v247_v20 }
  0x21   : > { %486 = vpow2.f32 %v220_v15  ;;  %v414_v28 = vadd.f32 -0.0019607844, %v247_v20  ;;  %v271_v36 = vadd.f32 0.0019607844, %v270_v33  ;;  %v417_v37 = vadd.f32 -0.0019607844, %v270_v33  ;;  %p515_p3 = por %p514_p2, %p513_p1 }
  0x22   : > { %488 = vpow2.f32 %v243_v17  ;;  %vm287_vm0 = vcmp.lt.s32.totalorder %v285_v1, 256 }
  0x23   : > { %490 = vpow2.f32 %v266_v21  ;;  %p516_p5 = pnand %p515_p3, %p509_p0 }
  0x29   : > { %v481_v24 = vpop.eup %480 }
  0x2a   : > { %v223_v26 = vmul.f32 0.70710677, %v481_v24  ;;  %v483_v29 = vpop.eup %482 }
  0x2b   : > { %v246_v32 = vmul.f32 0.70710677, %v483_v29  ;;  %v485_v38 = vpop.eup %484 }
  0x2c   : > { %v226_v30 = vmul.f32 %v225_v22, %v223_v26  ;;  %v229_v31 = vmul.f32 %v411_v23, %v223_v26  ;;  %v269_v39 = vmul.f32 0.70710677, %v485_v38 }
  0x2d   : > { %v249_v34 = vmul.f32 %v248_v27, %v246_v32  ;;  %v252_v35 = vmul.f32 %v414_v28, %v246_v32 }
  0x2e   : > { %492 = verf.f32 %v226_v30  ;;  %v487_v40 = vpop.eup %486  ;;  %v272_v42 = vmul.f32 %v271_v36, %v269_v39  ;;  %v275_v43 = vmul.f32 %v417_v37, %v269_v39 }
  0x2f   : > { %494 = verf.f32 %v229_v31  ;;  %v489_v41 = vpop.eup %488 }
  0x30   : > { %496 = verf.f32 %v249_v34  ;;  %v259_v44 = vadd.f32 %v489_v41, %v487_v40  ;;  %v491_v45 = vpop.eup %490 }
  0x31   : > { %498 = verf.f32 %v252_v35 }
  0x32   : > { %500 = verf.f32 %v272_v42  ;;  %v282_v47 = vadd.f32 %v491_v45, %v259_v44 }
  0x33   : > { %502 = verf.f32 %v275_v43 }
  0x34   : > { %504 = vrcp.f32 %v282_v47 }
  0x3b   : > { %v493_v46 = vpop.eup %492 }
  0x3c   : > { %v495_v48 = vpop.eup %494 }
  0x3d   : > { %v497_v49 = vpop.eup %496  ;;  %v231_v50 = vsub.f32 %v493_v46, %v495_v48 }
  0x3e   : > { %v499_v51 = vpop.eup %498 }
  0x3f   : > { %v232_v52 = vand.u32 2147483647, %v231_v50  ;;  %v254_v53 = vsub.f32 %v497_v49, %v499_v51  ;;  %v501_v56 = vpop.eup %500 }
  0x40   : > { %v503_v58 = vpop.eup %502 }
  0x41   : > { %v233_v54 = vmul.f32 0.5, %v232_v52  ;;  %v255_v55 = vand.u32 2147483647, %v254_v53  ;;  %v277_v61 = vsub.f32 %v501_v56, %v503_v58  ;;  %v505_v3 = vpop.eup %504 }
  0x43   : > { %v256_v57 = vmul.f32 0.5, %v255_v55  ;;  %v234_v59 = vmul.f32 %v487_v40, %v233_v54  ;;  %v278_v62 = vand.u32 2147483647, %v277_v61 }
  0x45   : > { %v257_v60 = vmul.f32 %v489_v41, %v256_v57  ;;  %v279_v0 = vmul.f32 0.5, %v278_v62 }
  0x47   : > { %v258_v63 = vadd.f32 %v257_v60, %v234_v59  ;;  %v280_v2 = vmul.f32 %v491_v45, %v279_v0 }
  0x49   : > { %v281_v4 = vadd.f32 %v280_v2, %v258_v63 }
  0x4b   : > { %v284_v5 = vmul.f32 %v505_v3, %v281_v4 }
  0x4d   : > { %289 = vst.msk [vmem:[%s185_s6] sm:$0x3] %vm287_vm0, %v284_v5 }
  0x4e   : > { %519 = shalt.err (!%p516_p5)
}
  0x4f   : > { %s520_s12 = scalar_lea.hbm %s305_s18, 32  ;;  %s524_s29 = scalar_lea.hbm %s715_s2, 64 }
  0x50   : > { %p521_p6 = scmp.ne.s32.totalorder %s305_s18, %s520_s12  ;;  %p525_p10 = scmp.lt.s32.totalorder %s305_s18, %s715_s2 }
  0x51   : > { %p526_p11 = scmp.lt.s32.totalorder %s524_s29, %s520_s12 }
  0x52   : > { %p522_p7 = pnand %p521_p6, %p640_p4 }
  0x53   : > { %p527_p12 = por %p526_p11, %p525_p10 }
  0x54   : > { %p523_p9 = pneg %p522_p7 }
  0x56   : > { %p528_p13 = pnand %p527_p12, %p523_p9 }
  0x58   : > { %531 = shalt.err (!%p528_p13)
}
  0x59   : > { %425 = dma.vmem_to_hbm [thread:$0]  (%p640_p4), %s308_s7, 32, %s305_s18, %s291_s20  }
  0x5a PF: > { %p431_p0 = scmp.ge.s32.totalorder %s582_s14, 2  ;;  %s319_s4 = sand.u32 1, %s562_s9  }
  0x5b   : > { %s320_s5 = scalar_lea.sflag [#allocation3], %s319_s4 }
  0x5c   : > { %p428_p1 = pnand %p431_p0, %p647_p8 }
  0x5e   : > { %p429_p2 = pneg %p428_p1 }
  0x60   : > { %557 = dma.done.wait (%p429_p2), %s320_s5, 32  }
  0x61   : > { %559 = vsyncadd (%p429_p2), %s320_s5, 4294967264  ;;  %s15_s14 = sadd.s32 1, %s582_s14   ;;  %s718_s9 = smov %s566_s10 }
  0x62   : > { %p12_p3 = scmp.ge.s32.totalorder %s15_s14, 4   ;;  %s719_s10 = smov %s570_s11 }
  0x63   : > { %s720_s11 = smov %s653_s22  ;;  %s721_s12 = smov %s578_s13 }
  0x64   : > { %s722_s13 = smov %s724_s17  ;;  %14 = sbr.rel (!%p12_p3) target bundleno = 4 (0x4), region = 74 }
  0x69   :  { %325 = vsyncpa [#allocation3], 1 }
  0x6a   :  { %327 = vsyncpa [#allocation3 + $0x1], 1 }

</bundles_post_ra>
